<compile_context>
chip_gen: v5e
topology: v5e:2x2
jax: 0.10.0
libtpu: 0.0.40
codegen_flags: <defaults>
</compile_context>

<pallas_src>
import functools
import math

import jax
import jax.numpy as jnp
from jax import lax
from jax.experimental import pallas as pl
from jax.experimental.pallas import tpu as pltpu


def _supcon_kernel(fq_ref, fk_ref, pm_ref, nm_ref, out_ref, pos_acc, neg_acc):
    qi = pl.program_id(0)          # query-row block (parallel)
    ki = pl.program_id(1)          # key-column block (reduction axis, last)

    @pl.when(ki == 0)
    def _init():
        pos_acc[...] = jnp.zeros_like(pos_acc)
        neg_acc[...] = jnp.zeros_like(neg_acc)

    # Features arrive pre-normalized with sqrt(1/T) folded into both sides, so this
    # NT matmul (contract the feature dim of both operands) yields cosim / T.
    logits = lax.dot_general(fq_ref[...], fk_ref[...], (((1,), (1,)), ((), ())),
                             preferred_element_type=jnp.float32)   # [tq, tk]
    # Like the PyTorch module, no max-subtraction before exp (cosine is bounded,
    # safe in f32 for temperature >= ~0.012).
    e = jnp.exp(logits)

    pm = pm_ref[...].astype(jnp.float32)   # int8 -> f32, cheap VPU work
    nm = nm_ref[...].astype(jnp.float32)
    ep = e * pm
    en = e * nm
    pos_acc[...] += jnp.sum(ep, axis=1, keepdims=True)
    neg_acc[...] += jnp.sum(en, axis=1, keepdims=True)

    # Self-contrast removal: subtract the global-diagonal contribution, but only
    # on tiles that actually straddle the diagonal (scalar-gated -> the iota /
    # compare / select / extra reduce work is skipped on almost every grid step).
    tq, tk = e.shape
    q0 = qi * tq
    k0 = ki * tk
    straddles = jnp.logical_and(q0 < k0 + tk, k0 < q0 + tq)

    @pl.when(straddles)
    def _remove_diag():
        g_row = lax.broadcasted_iota(jnp.int32, (tq, tk), 0) + q0
        g_col = lax.broadcasted_iota(jnp.int32, (tq, tk), 1) + k0
        on_diag = g_row == g_col
        pos_acc[...] -= jnp.sum(jnp.where(on_diag, ep, 0.0), axis=1, keepdims=True)
        neg_acc[...] -= jnp.sum(jnp.where(on_diag, en, 0.0), axis=1, keepdims=True)

    @pl.when(ki == pl.num_programs(1) - 1)
    def _finalize():
        p = pos_acc[...]
        out_ref[...] = jnp.log(p / (p + neg_acc[...]))   # [tq, 1] per-row log-ratio


def _pick_tile(n, preferred, min_blocks=1):
    for t in preferred:
        if n % t == 0 and n // t >= min_blocks:
            return t
    return n   # small problem: single block along this axis (full extent)


def supcon_loss(features, positive_mask, negative_mask,
                temperature=0.07, eps=1e-8, block_q=None, block_k=None):
    n, d = features.shape

    # Query tile: as large as possible but keep >= 2 blocks so the "parallel" axis
    # can shard across 2 TensorCores on v7x.  Key tile: as large as possible to
    # minimize grid steps / query-side re-reads.  All candidates are multiples of
    # (32, 128) so the int8 mask tiles meet layout constraints.
    tq = block_q if block_q is not None else _pick_tile(n, (512, 256, 128), min_blocks=2)
    tk = block_k if block_k is not None else _pick_tile(n, (512, 256, 128))
    assert n % tq == 0 and n % tk == 0, (n, tq, tk)

    # Normalize once (fused XLA op over N*D) and fold sqrt(1/T) into both sides so
    # q . k == cosim / T with a SINGLE shared operand array (no duplicate traffic).
    f = features.astype(jnp.float32)
    ss = jnp.sum(f * f, axis=-1, keepdims=True)
    fn = f * (math.sqrt(1.0 / temperature) * lax.rsqrt(jnp.maximum(ss, eps * eps)))

    # int8 masks: 4x less HBM traffic than f32 (the dominant stream for this kernel).
    pm_i8 = positive_mask.astype(jnp.int8)
    nm_i8 = negative_mask.astype(jnp.int8)

    # Double-buffered VMEM working set -> explicit vmem limit (clamped for v7x/v5e).
    ws = 2 * (tq * d * 4 + tk * d * 4 + 2 * tq * tk * 1 + tq * 4) + 2 * tq * 4
    vmem_limit = int(min(max(2 * ws, 32 << 20), 56 << 20))

    cost = pl.CostEstimate(
        flops=2 * n * n * d,
        transcendentals=n * n,
        bytes_accessed=n * d * 4 + (n // tq) * n * d * 4 + 2 * n * n * 1 + n * 4,
    )

    row_log_ratio = pl.pallas_call(
        _supcon_kernel,
        out_shape=jax.ShapeDtypeStruct((n, 1), jnp.float32),
        grid_spec=pltpu.PrefetchScalarGridSpec(
            num_scalar_prefetch=0,
            grid=(n // tq, n // tk),
            in_specs=[
                pl.BlockSpec((tq, d), lambda qi, ki: (qi, 0)),    # query rows (resident)
                pl.BlockSpec((tk, d), lambda qi, ki: (ki, 0)),    # key rows
                pl.BlockSpec((tq, tk), lambda qi, ki: (qi, ki)),  # positive mask (int8)
                pl.BlockSpec((tq, tk), lambda qi, ki: (qi, ki)),  # negative mask (int8)
            ],
            out_specs=pl.BlockSpec((tq, 1), lambda qi, ki: (qi, 0)),
            scratch_shapes=[pltpu.VMEM((tq, 1), jnp.float32),     # pos accumulator
                            pltpu.VMEM((tq, 1), jnp.float32)],    # neg accumulator
        ),
        compiler_params=pltpu.CompilerParams(
            dimension_semantics=("parallel", "arbitrary"),
            vmem_limit_bytes=vmem_limit),
        cost_estimate=cost,
    )(fn, fn, pm_i8, nm_i8)

    return -jnp.mean(row_log_ratio)


def supcon_loss_ref(features, positive_mask, negative_mask,
                    temperature=0.07, eps=1e-8):
    # Pure-JAX reference mirroring the PyTorch module semantics.
    f = features.astype(jnp.float32)
    n = f.shape[0]
    norms = jnp.maximum(jnp.linalg.norm(f, axis=-1, keepdims=True), eps)
    cosim = (f @ f.T) / (norms * norms.T) / temperature
    e = jnp.exp(cosim)
    not_diag = 1.0 - jnp.eye(n, dtype=jnp.float32)
    pos = jnp.sum(e * positive_mask.astype(jnp.float32) * not_diag, axis=1)
    neg = jnp.sum(e * negative_mask.astype(jnp.float32) * not_diag, axis=1)
    return -jnp.mean(jnp.log(pos / (pos + neg)))


def _make_masks(labels):
    same = labels[:, None] == labels[None, :]
    # Masks produced directly as int8: no wrapper-side cast, minimum HBM traffic.
    return same.astype(jnp.int8), (~same).astype(jnp.int8)


if __name__ == "__main__":
    key = jax.random.PRNGKey(0)

    # Case 1: tiny shapes (batch=8, hidden=32) -> single-block grid (1, 1).
    n1, d1 = 8, 32
    f1 = jax.random.normal(key, (n1, d1), dtype=jnp.float32)
    labels1 = jnp.arange(n1, dtype=jnp.int32) % 2
    pm1, nm1 = _make_masks(labels1)
    out1 = jax.block_until_ready(supcon_loss(f1, pm1, nm1))
    ref1 = supcon_loss_ref(f1, pm1, nm1)
    assert jnp.allclose(out1, ref1, rtol=1e-3, atol=1e-3), (out1, ref1)

    # Case 2: exercises the tiled path -> grid (2, 2); off-diagonal tiles skip the
    # diagonal-removal work via the scalar pl.when gate.
    n2, d2 = 256, 64
    f2 = jax.random.normal(jax.random.fold_in(key, 1), (n2, d2), dtype=jnp.float32)
    labels2 = jnp.arange(n2, dtype=jnp.int32) % 4
    pm2, nm2 = _make_masks(labels2)
    out2 = jax.block_until_ready(
        supcon_loss(f2, pm2, nm2, block_q=128, block_k=128))
    ref2 = supcon_loss_ref(f2, pm2, nm2)
    assert jnp.allclose(out2, ref2, rtol=1e-3, atol=1e-3), (out2, ref2)

    print("KERNEL_OK")
</pallas_src>

<mosaic_0001>
module attributes {stable_mosaic.version = 11 : i64} {
  func.func @_supcon_kernel(%arg0: i32, %arg1: i32, %arg2: memref<8x32xf32, #tpu.memory_space<vmem>>, %arg3: memref<8x32xf32, #tpu.memory_space<vmem>>, %arg4: memref<8x8xi8, #tpu.memory_space<vmem>>, %arg5: memref<8x8xi8, #tpu.memory_space<vmem>>, %arg6: memref<8x1xf32, #tpu.memory_space<vmem>>, %arg7: memref<8x1xf32, #tpu.memory_space<vmem>>, %arg8: memref<8x1xf32, #tpu.memory_space<vmem>>) attributes {dimension_semantics = [#tpu.dimension_semantics<parallel>, #tpu.dimension_semantics<arbitrary>], iteration_bounds = array<i64: 1, 1>, scalar_prefetch = 0 : i64, scratch_operands = 2 : i64, tpu.core_type = #tpu.core_type<tc>, window_params = [{transform_indices = @transform_0, window_bounds = array<i64: 8, 32>}, {transform_indices = @transform_1, window_bounds = array<i64: 8, 32>}, {transform_indices = @transform_2, window_bounds = array<i64: 8, 8>}, {transform_indices = @transform_3, window_bounds = array<i64: 8, 8>}, {transform_indices = @transform_4, window_bounds = array<i64: 8, 1>}]} {
    %c0_i32 = arith.constant 0 : i32
    %0 = arith.cmpi eq, %arg1, %c0_i32 : i32
    %1 = arith.extui %0 : i1 to i32
    %c0_i32_0 = arith.constant 0 : i32
    %2 = arith.cmpi ne, %1, %c0_i32_0 : i32
    scf.if %2 {
      %cst_24 = arith.constant 0.000000e+00 : f32
      %35 = vector.broadcast %cst_24 : f32 to vector<8x1xf32>
      %c0_25 = arith.constant 0 : index
      %c0_26 = arith.constant 0 : index
      %36 = vector.load %arg7[%c0_25, %c0_26] : memref<8x1xf32, #tpu.memory_space<vmem>>, vector<8x1xf32>
      tpu.vector_store %arg7[%c0_25, %c0_26], %35 {strides = array<i32>} : memref<8x1xf32, #tpu.memory_space<vmem>>, vector<8x1xf32>,
      %cst_27 = arith.constant 0.000000e+00 : f32
      %37 = vector.broadcast %cst_27 : f32 to vector<8x1xf32>
      %c0_28 = arith.constant 0 : index
      %c0_29 = arith.constant 0 : index
      %38 = vector.load %arg8[%c0_28, %c0_29] : memref<8x1xf32, #tpu.memory_space<vmem>>, vector<8x1xf32>
      tpu.vector_store %arg8[%c0_28, %c0_29], %37 {strides = array<i32>} : memref<8x1xf32, #tpu.memory_space<vmem>>, vector<8x1xf32>,
    } else {
    }
    %c0 = arith.constant 0 : index
    %c0_1 = arith.constant 0 : index
    %3 = vector.load %arg2[%c0, %c0_1] : memref<8x32xf32, #tpu.memory_space<vmem>>, vector<8x32xf32>
    %c0_2 = arith.constant 0 : index
    %c0_3 = arith.constant 0 : index
    %4 = vector.load %arg3[%c0_2, %c0_3] : memref<8x32xf32, #tpu.memory_space<vmem>>, vector<8x32xf32>
    %cst = arith.constant dense<0.000000e+00> : vector<8x8xf32>
    %5 = tpu.matmul %3, %4, %cst {dimension_numbers = #tpu.dot_dimension_numbers<[1], [1], [0], [0], [0, 0, 1, 0], [], []>} : vector<8x32xf32>, vector<8x32xf32>, vector<8x8xf32> -> vector<8x8xf32>
    %6 = math.exp %5 : vector<8x8xf32>
    %c0_4 = arith.constant 0 : index
    %c0_5 = arith.constant 0 : index
    %7 = vector.load %arg4[%c0_4, %c0_5] : memref<8x8xi8, #tpu.memory_space<vmem>>, vector<8x8xi8>
    %8 = arith.sitofp %7 : vector<8x8xi8> to vector<8x8xf32>
    %c0_6 = arith.constant 0 : index
    %c0_7 = arith.constant 0 : index
    %9 = vector.load %arg5[%c0_6, %c0_7] : memref<8x8xi8, #tpu.memory_space<vmem>>, vector<8x8xi8>
    %10 = arith.sitofp %9 : vector<8x8xi8> to vector<8x8xf32>
    %11 = arith.mulf %6, %8 : vector<8x8xf32>
    %12 = arith.mulf %6, %10 : vector<8x8xf32>
    %c0_8 = arith.constant 0 : index
    %c0_9 = arith.constant 0 : index
    %13 = vector.load %arg7[%c0_8, %c0_9] : memref<8x1xf32, #tpu.memory_space<vmem>>, vector<8x1xf32>
    %cst_10 = arith.constant dense<0.000000e+00> : vector<8xf32>
    %14 = vector.multi_reduction <add>, %11, %cst_10 [1] : vector<8x8xf32> to vector<8xf32>
    %15 = vector.shape_cast %14 : vector<8xf32> to vector<8x1xf32>
    %16 = arith.addf %13, %15 : vector<8x1xf32>
    %c0_11 = arith.constant 0 : index
    %c0_12 = arith.constant 0 : index
    %17 = vector.load %arg7[%c0_11, %c0_12] : memref<8x1xf32, #tpu.memory_space<vmem>>, vector<8x1xf32>
    tpu.vector_store %arg7[%c0_11, %c0_12], %16 {strides = array<i32>} : memref<8x1xf32, #tpu.memory_space<vmem>>, vector<8x1xf32>,
    %c0_13 = arith.constant 0 : index
    %c0_14 = arith.constant 0 : index
    %18 = vector.load %arg8[%c0_13, %c0_14] : memref<8x1xf32, #tpu.memory_space<vmem>>, vector<8x1xf32>
    %cst_15 = arith.constant dense<0.000000e+00> : vector<8xf32>
    %19 = vector.multi_reduction <add>, %12, %cst_15 [1] : vector<8x8xf32> to vector<8xf32>
    %20 = vector.shape_cast %19 : vector<8xf32> to vector<8x1xf32>
    %21 = arith.addf %18, %20 : vector<8x1xf32>
    %c0_16 = arith.constant 0 : index
    %c0_17 = arith.constant 0 : index
    %22 = vector.load %arg8[%c0_16, %c0_17] : memref<8x1xf32, #tpu.memory_space<vmem>>, vector<8x1xf32>
    tpu.vector_store %arg8[%c0_16, %c0_17], %21 {strides = array<i32>} : memref<8x1xf32, #tpu.memory_space<vmem>>, vector<8x1xf32>,
    %c8_i32 = arith.constant 8 : i32
    %23 = arith.muli %arg0, %c8_i32 : i32
    %c8_i32_18 = arith.constant 8 : i32
    %24 = arith.muli %arg1, %c8_i32_18 : i32
    %c8_i32_19 = arith.constant 8 : i32
    %25 = arith.addi %24, %c8_i32_19 : i32
    %26 = arith.cmpi slt, %23, %25 : i32
    %c8_i32_20 = arith.constant 8 : i32
    %27 = arith.addi %23, %c8_i32_20 : i32
    %28 = arith.cmpi slt, %24, %27 : i32
    %29 = arith.andi %26, %28 : i1
    %30 = arith.extui %29 : i1 to i32
    %c0_i32_21 = arith.constant 0 : i32
    %31 = arith.cmpi ne, %30, %c0_i32_21 : i32
    scf.if %31 {
      %35 = tpu.iota {dimensions = array<i32: 0>} : vector<8x8xi32>
      %36 = vector.broadcast %23 : i32 to vector<8x8xi32>
      %37 = arith.addi %35, %36 : vector<8x8xi32>
      %38 = tpu.iota {dimensions = array<i32: 1>} : vector<8x8xi32>
      %39 = vector.broadcast %24 : i32 to vector<8x8xi32>
      %40 = arith.addi %38, %39 : vector<8x8xi32>
      %41 = arith.cmpi eq, %37, %40 : vector<8x8xi32>
      %c0_24 = arith.constant 0 : index
      %c0_25 = arith.constant 0 : index
      %42 = vector.load %arg7[%c0_24, %c0_25] : memref<8x1xf32, #tpu.memory_space<vmem>>, vector<8x1xf32>
      %cst_26 = arith.constant 0.000000e+00 : f32
      %43 = vector.broadcast %cst_26 : f32 to vector<8x8xf32>
      %44 = arith.select %41, %11, %43 : vector<8x8xi1>, vector<8x8xf32>
      %cst_27 = arith.constant dense<0.000000e+00> : vector<8xf32>
      %45 = vector.multi_reduction <add>, %44, %cst_27 [1] : vector<8x8xf32> to vector<8xf32>
      %46 = vector.shape_cast %45 : vector<8xf32> to vector<8x1xf32>
      %47 = arith.subf %42, %46 : vector<8x1xf32>
      %c0_28 = arith.constant 0 : index
      %c0_29 = arith.constant 0 : index
      %48 = vector.load %arg7[%c0_28, %c0_29] : memref<8x1xf32, #tpu.memory_space<vmem>>, vector<8x1xf32>
      tpu.vector_store %arg7[%c0_28, %c0_29], %47 {strides = array<i32>} : memref<8x1xf32, #tpu.memory_space<vmem>>, vector<8x1xf32>,
      %c0_30 = arith.constant 0 : index
      %c0_31 = arith.constant 0 : index
      %49 = vector.load %arg8[%c0_30, %c0_31] : memref<8x1xf32, #tpu.memory_space<vmem>>, vector<8x1xf32>
      %cst_32 = arith.constant 0.000000e+00 : f32
      %50 = vector.broadcast %cst_32 : f32 to vector<8x8xf32>
      %51 = arith.select %41, %12, %50 : vector<8x8xi1>, vector<8x8xf32>
      %cst_33 = arith.constant dense<0.000000e+00> : vector<8xf32>
      %52 = vector.multi_reduction <add>, %51, %cst_33 [1] : vector<8x8xf32> to vector<8xf32>
      %53 = vector.shape_cast %52 : vector<8xf32> to vector<8x1xf32>
      %54 = arith.subf %49, %53 : vector<8x1xf32>
      %c0_34 = arith.constant 0 : index
      %c0_35 = arith.constant 0 : index
      %55 = vector.load %arg8[%c0_34, %c0_35] : memref<8x1xf32, #tpu.memory_space<vmem>>, vector<8x1xf32>
      tpu.vector_store %arg8[%c0_34, %c0_35], %54 {strides = array<i32>} : memref<8x1xf32, #tpu.memory_space<vmem>>, vector<8x1xf32>,
    } else {
    }
    %c0_i32_22 = arith.constant 0 : i32
    %32 = arith.cmpi eq, %arg1, %c0_i32_22 : i32
    %33 = arith.extui %32 : i1 to i32
    %c0_i32_23 = arith.constant 0 : i32
    %34 = arith.cmpi ne, %33, %c0_i32_23 : i32
    scf.if %34 {
      %c0_24 = arith.constant 0 : index
      %c0_25 = arith.constant 0 : index
      %35 = vector.load %arg7[%c0_24, %c0_25] : memref<8x1xf32, #tpu.memory_space<vmem>>, vector<8x1xf32>
      %c0_26 = arith.constant 0 : index
      %c0_27 = arith.constant 0 : index
      %36 = vector.load %arg8[%c0_26, %c0_27] : memref<8x1xf32, #tpu.memory_space<vmem>>, vector<8x1xf32>
      %37 = arith.addf %35, %36 : vector<8x1xf32>
      %38 = arith.divf %35, %37 : vector<8x1xf32>
      %39 = math.log %38 : vector<8x1xf32>
      %c0_28 = arith.constant 0 : index
      %c0_29 = arith.constant 0 : index
      %40 = vector.load %arg6[%c0_28, %c0_29] : memref<8x1xf32, #tpu.memory_space<vmem>>, vector<8x1xf32>
      tpu.vector_store %arg6[%c0_28, %c0_29], %39 {strides = array<i32>} : memref<8x1xf32, #tpu.memory_space<vmem>>, vector<8x1xf32>,
    } else {
    }
    return
  }
  func.func @transform_0(%arg0: i32, %arg1: i32) -> (i32, i32) {
    %c0_i32 = arith.constant 0 : i32
    %c0_i32_0 = arith.constant 0 : i32
    return %arg0, %c0_i32 : i32, i32
  }
  func.func @transform_1(%arg0: i32, %arg1: i32) -> (i32, i32) {
    %c0_i32 = arith.constant 0 : i32
    %c0_i32_0 = arith.constant 0 : i32
    return %arg1, %c0_i32 : i32, i32
  }
  func.func @transform_2(%arg0: i32, %arg1: i32) -> (i32, i32) {
    %c0_i32 = arith.constant 0 : i32
    return %arg0, %arg1 : i32, i32
  }
  func.func @transform_3(%arg0: i32, %arg1: i32) -> (i32, i32) {
    %c0_i32 = arith.constant 0 : i32
    return %arg0, %arg1 : i32, i32
  }
  func.func @transform_4(%arg0: i32, %arg1: i32) -> (i32, i32) {
    %c0_i32 = arith.constant 0 : i32
    %c0_i32_0 = arith.constant 0 : i32
    return %arg0, %c0_i32 : i32, i32
  }
}

</mosaic_0001>

<bundles_post_ra>
// kernel: tpu_custom_call.1
= control target key start
LH: loop header
LB: loop body
LE: loop exit
PB: predicated region body
PF: predicated region fallthrough
CT: control target
= control target key end

     0   :  { %9 = vsyncpa [#allocation5], 0  ;;  %s320_s0 = inlined_call_operand.hbm [shape: f32[8,32], index: 0, kind: input, shape index: {}]   ;;  %s321_s1 = inlined_call_operand.hbm [shape: f32[8,32], index: 1, kind: input, shape index: {}]   ;;  %s322_s2 = inlined_call_operand.hbm [shape: s8[8,8], index: 2, kind: input, shape index: {}]   ;;  %s323_s3 = inlined_call_operand.vmem [shape: s8[8,8], index: 3, kind: input, shape index: {}]   ;;  %s324_s4 = inlined_call_operand.vmem [shape: f32[8,1], index: 4, kind: output, shape index: {}]  }
   0x1   :  { %10 = vsyncpa [#allocation7], 0  ;;  %s27_s17 = sshll.u32 %s321_s1, 4  ;;  %s269_s18 = smov [#allocation6]   ;;  %s28_s17 = int_to_ptr.hbm [resolvable:$true] %s27_s17 }
   0x2   :  { %s29_s19 = sshll.u32 %s269_s18, 4  ;;  %s16_s22 = sshll.u32 %s320_s0, 4  ;;  %s30_s19 = int_to_ptr.vmem [resolvable:$true] %s29_s19  ;;  %s17_s22 = int_to_ptr.hbm [resolvable:$true] %s16_s22 }
   0x3   :  { %32 = dma.hbm_to_vmem [thread:$0]  %s28_s17, 128, %s30_s19, [#allocation7]  }
   0x4   :  { %s270_s23 = smov [#allocation4]   ;;  %s38_s27 = sshll.u32 %s322_s2, 4  ;;  %s39_s27 = int_to_ptr.hbm [resolvable:$true] %s38_s27 }
   0x5   :  { %s18_s24 = sshll.u32 %s270_s23, 4  ;;  %s271_s1 = smov [#allocation8]   ;;  %s19_s24 = int_to_ptr.vmem [resolvable:$true] %s18_s24 }
   0x6   :  { %21 = dma.hbm_to_vmem [thread:$0]  %s17_s22, 128, %s19_s24, [#allocation5]  }
   0x7   :  { %s40_s28 = sshll.u32 %s271_s1, 4  ;;  %s41_s28 = int_to_ptr.vmem [resolvable:$true] %s40_s28 }
   0x8   :  { %43 = dma.hbm_to_vmem [thread:$0]  %s39_s27, 32, %s41_s28, [#allocation7]  }
   0x9   :  { %265 = dma.done.wait [#allocation5], 128  }
   0xa   :  { %266 = vsyncadd [#allocation5], 4294967168 }
   0xb   :  { %267 = dma.done.wait [#allocation7], 160  }
   0xc   :  { %268 = vsyncadd [#allocation7], 4294967136  ;;  %vm67_vm0 = vcmask 261120   ;;  %v66_v0 = vld [vmem:[#allocation6] sm:$0xff]  ;;  %v65_v1 = vld [vmem:[#allocation4] sm:$0xff]  ;;  %vm62_vm1 = vcmask 7168   ;;  %v128_v6 = vlaneseq }
   0xd   :  { %181 = vmatpush.xpose.msk.msra.mxu0 %vm67_vm0, %v66_v0  ;;  %v272_v2 = vmov 0.0   ;;  %v96_v3 = vld [vmem:[#allocation8] sm:$0x3]  ;;  %vm105_vm2 = vcmask 64512  }
   0xe   :  { %63 = vst.msk [vmem:[#allocation2] sm:$0xff] %vm62_vm1, %v272_v2  ;;  %v97_v7 = vunpack.c.0.s8 %v96_v3  ;;  %v99_v8 = vld [vmem:[%s323_s3] sm:$0x3]  ;;  %v129_v9 = vshrl.u32 %v128_v6, 7  ;;  %v133_v10 = vand.u32 127, %v128_v6 }
   0xf   :  { %64 = vst.msk [vmem:[#allocation3] sm:$0xff] %vm62_vm1, %v272_v2  ;;  %v100_v12 = vunpack.c.0.s8 %v99_v8 }
  0x10   :  { %182 = vmatmul.msk.f32.vlgmr.msra.gmra.mxu0 %vm67_vm0, %v65_v1  ;;  %v98_v11 = vcvt.s32.f32 %v97_v7  ;;  %vm136_vm3 = vcmp.eq.s32.totalorder %v129_v9, %v133_v10 }
  0x11   :  { %v101_v15 = vcvt.s32.f32 %v100_v12 }
  0x15   :  { %v104_v23 = vld [vmem:[#allocation2] sm:$0xff] }
  0x16   :  { %v112_v26 = vld [vmem:[#allocation3] sm:$0xff] }
  0x8d   :  { %v91_v4 = vpop.f32.mrf.mxu0 }
  0x8e   :  { %v94_v5 = vmul.f32 1.442695, %v91_v4 }
  0x90   :  { %187 = vpow2.f32 %v94_v5 }
  0x96   :  { %v188_v13 = vpop.eup %187 }
  0x97   :  { %v102_v14 = vmul.f32 %v188_v13, %v98_v11  ;;  %v103_v19 = vmul.f32 %v188_v13, %v101_v15 }
  0x99   :  { %v106_v16 = vsel %vm105_vm2, %v102_v14, 0.0  ;;  %v138_v17 = vsel %vm136_vm3, %v102_v14, 0.0  ;;  %v145_v20 = vsel %vm136_vm3, %v103_v19, 0.0  ;;  %v113_v21 = vsel %vm105_vm2, %v103_v19, 0.0 }
  0x9a   :  { %107 = vadd.xlane.f32.xlu0 %v106_v16  ;;  %v139_v18 = vsel %vm105_vm2, %v138_v17, 0.0  ;;  %v146_v22 = vsel %vm105_vm2, %v145_v20, 0.0 }
  0x9b   :  { %140 = vadd.xlane.f32.xlu1 %v139_v18 }
  0xa2   :  { %114 = vadd.xlane.f32.xlu0 %v113_v21 }
  0xa3   :  { %147 = vadd.xlane.f32.xlu1 %v146_v22 }
 0x10d   :  { %v108_v24 = vpop.xlane.xlu0 %107 }
 0x10e   :  { %v109_v25 = vadd.f32 %v108_v24, %v104_v23  ;;  %v141_v27 = vpop.xlane.xlu1 %140 }
 0x110   :  { %111 = vst.msk [vmem:[#allocation2] sm:$0xff] %vm62_vm1, %v109_v25 }
 0x115   :  { %v115_v28 = vpop.xlane.xlu0 %114 }
 0x116   :  { %v116_v29 = vadd.f32 %v115_v28, %v112_v26  ;;  %v148_v32 = vpop.xlane.xlu1 %147 }
 0x117   :  { %v137_v30 = vld [vmem:[#allocation2] sm:$0xff] }
 0x118   :  { %v142_v31 = vsub.f32 %v137_v30, %v141_v27  ;;  %117 = vst.msk [vmem:[#allocation3] sm:$0xff] %vm62_vm1, %v116_v29 }
 0x11a   :  { %143 = vst.msk [vmem:[#allocation2] sm:$0xff] %vm62_vm1, %v142_v31 }
 0x11f   :  { %v144_v33 = vld [vmem:[#allocation3] sm:$0xff] }
 0x120   :  { %v149_v34 = vsub.f32 %v144_v33, %v148_v32 }
 0x121   :  { %v154_v35 = vld [vmem:[#allocation2] sm:$0xff] }
 0x122   :  { %150 = vst.msk [vmem:[#allocation3] sm:$0xff] %vm62_vm1, %v149_v34 }
 0x129   :  { %v155_v36 = vld [vmem:[#allocation3] sm:$0xff] }
 0x12a   :  { %v156_v37 = vadd.f32 %v155_v36, %v154_v35 }
 0x12c   :  { %189 = vrcp.f32 %v156_v37  ;;  %v168_v41 = vand.u32 2147483648, %v156_v37  ;;  %v166_v43 = vand.u32 2147483647, %v156_v37  ;;  %vm162_vm5 = vweird.f32 %v156_v37 }
 0x12e   :  { %v169_v45 = vor.u32 1.1754944e-38, %v168_v41  ;;  %vm167_vm7 = vcmp.eq.f32.partialorder %v166_v43, 8.507059e+37 }
 0x132   :  { %v190_v38 = vpop.eup %189 }
 0x133   :  { %v158_v39 = vmul.f32 %v190_v38, %v156_v37  ;;  %vm163_vm4 = vweird.f32 %v190_v38 }
 0x134   :  { %vm164_vm6 = vmor %vm162_vm5, %vm163_vm4 }
 0x135   :  { %v159_v40 = vsub.f32 1.0, %v158_v39 }
 0x137   :  { %v160_v42 = vmul.f32 %v190_v38, %v159_v40 }
 0x139   :  { %v161_v44 = vadd.f32 %v190_v38, %v160_v42 }
 0x13b   :  { %v165_v46 = vsel %vm164_vm6, %v190_v38, %v161_v44 }
 0x13c   :  { %v170_v47 = vsel %vm167_vm7, %v169_v45, %v165_v46 }
 0x13d   :  { %v171_v48 = vmul.f32 %v170_v47, %v154_v35 }
 0x13f   :  { %191 = vlog2.f32 %v171_v48 }
 0x145   :  { %v192_v49 = vpop.eup %191 }
 0x146   :  { %v173_v50 = vmul.f32 0.6931472, %v192_v49 }
 0x148   :  { %174 = vst.msk [vmem:[%s324_s4] sm:$0xff] %vm62_vm1, %v173_v50 }
 0x149   :  { %179 = vsyncpa [#allocation5], 1 }
 0x14a   :  { %180 = vsyncpa [#allocation7], 1 }

</bundles_post_ra>
